<compile_context>
chip_gen: v7x
topology: tpu7x:2x2x1
jax: 0.10.0
libtpu: 0.0.40
codegen_flags: <defaults>
</compile_context>

<pallas_src>
import jax
import jax.numpy as jnp
from jax.experimental import pallas as pl
from jax.experimental.pallas import tpu as pltpu


LANE = 128
SUBLANE = 8


def _round_up(x, m):
    return ((x + m - 1) // m) * m


def mlp_kernel(x_ref, w1_ref, b1_ref, w2_ref, b2_ref, o_ref):
    x = x_ref[...]                                  # [tb, in]  (in = 2)

    # Layer 1 on the VPU: tiny-K contraction as broadcast FMAs, accumulator
    # initialized with the bias (hoisted bias add, no MXU push/pop for a ~0%-utilized
    # matmul).
    h = b1_ref[...]                                 # [1, hidden_p]
    for k in range(x_ref.shape[1]):                 # static unroll (in_features = 2)
        h = h + x[:, k:k + 1] * w1_ref[k:k + 1, :]  # [tb,1] * [1,hidden_p] -> [tb,hidden_p]
    h = jnp.maximum(h, 0.0)                         # ReLU

    # Layer 2 on the MXU: [tb, 128] @ [128, out] with f32 accumulation.
    o = jnp.dot(h, w2_ref[...], preferred_element_type=jnp.float32) + b2_ref[...]

    # De-padded output store: [tb, 3] masked vst — tiny, and it cuts HBM writeback ~42x
    # versus a 128-lane-padded output.
    o_ref[...] = o.astype(o_ref.dtype)


def pad_params(w1, b1, w2, b2):
    """Pad the *hidden* dim to 128 lanes once, at parameter-setup time.

    w1: [in, hidden]; b1: [1, hidden]; w2: [hidden, out]; b2: [1, out].
    Padded hidden lanes are exactly zero, stay zero through ReLU, and contribute
    zero to the second matmul, so forward semantics are preserved.
    """
    in_features, hidden = w1.shape
    out_features = w2.shape[1]
    hidden_p = _round_up(hidden, LANE)

    w1_p = jnp.zeros((in_features, hidden_p), w1.dtype).at[:, :hidden].set(w1)
    b1_p = jnp.zeros((1, hidden_p), b1.dtype).at[:, :hidden].set(b1)
    w2_p = jnp.zeros((hidden_p, out_features), w2.dtype).at[:hidden, :].set(w2)
    b2_p = b2.reshape(1, out_features)
    return w1_p, b1_p, w2_p, b2_p


def simple_nn_forward(x, w1_p, b1_p, w2_p, b2_p, *, batch_tile=8192):
    """x: [B, in]; padded params from pad_params(). Returns [B, out]."""
    B, in_features = x.shape
    hidden_p = w1_p.shape[1]
    out_features = w2_p.shape[1]
    dtype_bytes = jnp.dtype(x.dtype).itemsize

    # Batch tile: clamp to a multiple of 8 (sublane rule) and never larger than needed.
    tb = min(batch_tile, _round_up(B, SUBLANE))
    tb = max(SUBLANE, (tb // SUBLANE) * SUBLANE)

    grid = (pl.cdiv(B, tb),)

    cost = pl.CostEstimate(
        flops=2 * B * in_features * hidden_p + 2 * B * hidden_p * out_features,
        transcendentals=0,
        bytes_accessed=(
            B * in_features * dtype_bytes            # x read
            + in_features * hidden_p * dtype_bytes   # w1
            + hidden_p * dtype_bytes                 # b1
            + hidden_p * out_features * dtype_bytes  # w2
            + out_features * dtype_bytes             # b2
            + B * out_features * dtype_bytes         # output write
        ),
    )

    return pl.pallas_call(
        mlp_kernel,
        out_shape=jax.ShapeDtypeStruct((B, out_features), x.dtype),
        grid=grid,
        in_specs=[
            pl.BlockSpec((tb, in_features), lambda i: (i, 0)),        # streamed x tile
            pl.BlockSpec((in_features, hidden_p), lambda i: (0, 0)),  # resident weights
            pl.BlockSpec((1, hidden_p), lambda i: (0, 0)),
            pl.BlockSpec((hidden_p, out_features), lambda i: (0, 0)),
            pl.BlockSpec((1, out_features), lambda i: (0, 0)),
        ],
        out_specs=pl.BlockSpec((tb, out_features), lambda i: (i, 0)),
        compiler_params=pltpu.CompilerParams(
            dimension_semantics=("parallel",),
        ),
        cost_estimate=cost,
    )(x, w1_p, b1_p, w2_p, b2_p)


if __name__ == "__main__":
    input_size, hidden_size, output_size = 2, 20, 3
    batch = 16

    key = jax.random.PRNGKey(0)
    kx, kw1, kb1, kw2, kb2 = jax.random.split(key, 5)

    # Deterministic parameter init (shapes match nn.Linear; weights stored transposed [in, out]).
    x = jax.random.normal(kx, (batch, input_size), dtype=jnp.float32)
    w1 = jax.random.normal(kw1, (input_size, hidden_size), dtype=jnp.float32) * 0.1
    b1 = jax.random.normal(kb1, (1, hidden_size), dtype=jnp.float32) * 0.1
    w2 = jax.random.normal(kw2, (hidden_size, output_size), dtype=jnp.float32) * 0.1
    b2 = jax.random.normal(kb2, (1, output_size), dtype=jnp.float32) * 0.1

    # Padding of the (tiny) weights happens once, outside the per-call path.
    w1_p, b1_p, w2_p, b2_p = pad_params(w1, b1, w2, b2)

    out = simple_nn_forward(x, w1_p, b1_p, w2_p, b2_p)
    jax.block_until_ready(out)

    # Cross-check against a plain-JAX reference of the same forward pass.
    ref = jnp.maximum(x @ w1 + b1, 0.0) @ w2 + b2
    assert out.shape == (batch, output_size)
    assert jnp.allclose(out, ref, atol=1e-5, rtol=1e-5)

    print("KERNEL_OK")
</pallas_src>

<mosaic_0001>
module attributes {stable_mosaic.version = 11 : i64} {
  func.func @mlp_kernel(%arg0: i32, %arg1: memref<16x2xf32, #tpu.memory_space<vmem>>, %arg2: memref<2x128xf32, #tpu.memory_space<vmem>>, %arg3: memref<1x128xf32, #tpu.memory_space<vmem>>, %arg4: memref<128x3xf32, #tpu.memory_space<vmem>>, %arg5: memref<1x3xf32, #tpu.memory_space<vmem>>, %arg6: memref<16x3xf32, #tpu.memory_space<vmem>>) attributes {dimension_semantics = [#tpu.dimension_semantics<parallel>], iteration_bounds = array<i64: 1>, scalar_prefetch = 0 : i64, scratch_operands = 0 : i64, tpu.core_type = #tpu.core_type<tc>, window_params = [{transform_indices = @transform_0, window_bounds = array<i64: 16, 2>}, {pipeline_mode = #tpu.pipeline_mode<synchronous>, transform_indices = @transform_1, window_bounds = array<i64: 2, 128>}, {pipeline_mode = #tpu.pipeline_mode<synchronous>, transform_indices = @transform_2, window_bounds = array<i64: 1, 128>}, {pipeline_mode = #tpu.pipeline_mode<synchronous>, transform_indices = @transform_3, window_bounds = array<i64: 128, 3>}, {pipeline_mode = #tpu.pipeline_mode<synchronous>, transform_indices = @transform_4, window_bounds = array<i64: 1, 3>}, {transform_indices = @transform_5, window_bounds = array<i64: 16, 3>}]} {
    %c0 = arith.constant 0 : index
    %c0_0 = arith.constant 0 : index
    %0 = vector.load %arg1[%c0, %c0_0] : memref<16x2xf32, #tpu.memory_space<vmem>>, vector<16x2xf32>
    %c0_1 = arith.constant 0 : index
    %c0_2 = arith.constant 0 : index
    %1 = vector.load %arg3[%c0_1, %c0_2] : memref<1x128xf32, #tpu.memory_space<vmem>>, vector<1x128xf32>
    %2 = vector.extract_strided_slice %0 {offsets = [0, 0], sizes = [16, 1], strides = [1, 1]} : vector<16x2xf32> to vector<16x1xf32>
    %c0_3 = arith.constant 0 : index
    %c0_4 = arith.constant 0 : index
    %3 = vector.load %arg2[%c0_3, %c0_4] : memref<2x128xf32, #tpu.memory_space<vmem>>, vector<1x128xf32>
    %4 = vector.broadcast %2 : vector<16x1xf32> to vector<16x128xf32>
    %5 = vector.broadcast %3 : vector<1x128xf32> to vector<16x128xf32>
    %6 = arith.mulf %4, %5 : vector<16x128xf32>
    %7 = vector.broadcast %1 : vector<1x128xf32> to vector<16x128xf32>
    %8 = arith.addf %7, %6 : vector<16x128xf32>
    %9 = vector.extract_strided_slice %0 {offsets = [0, 1], sizes = [16, 1], strides = [1, 1]} : vector<16x2xf32> to vector<16x1xf32>
    %c1 = arith.constant 1 : index
    %c0_5 = arith.constant 0 : index
    %10 = vector.load %arg2[%c1, %c0_5] : memref<2x128xf32, #tpu.memory_space<vmem>>, vector<1x128xf32>
    %11 = vector.broadcast %9 : vector<16x1xf32> to vector<16x128xf32>
    %12 = vector.broadcast %10 : vector<1x128xf32> to vector<16x128xf32>
    %13 = arith.mulf %11, %12 : vector<16x128xf32>
    %14 = arith.addf %8, %13 : vector<16x128xf32>
    %cst = arith.constant 0.000000e+00 : f32
    %15 = vector.broadcast %cst : f32 to vector<16x128xf32>
    %16 = arith.maximumf %14, %15 : vector<16x128xf32>
    %c0_6 = arith.constant 0 : index
    %c0_7 = arith.constant 0 : index
    %17 = vector.load %arg4[%c0_6, %c0_7] : memref<128x3xf32, #tpu.memory_space<vmem>>, vector<128x3xf32>
    %cst_8 = arith.constant dense<0.000000e+00> : vector<16x3xf32>
    %18 = tpu.matmul %16, %17, %cst_8 {dimension_numbers = #tpu.dot_dimension_numbers<[1], [0], [0], [1], [0, 0, 1, 1], [], []>} : vector<16x128xf32>, vector<128x3xf32>, vector<16x3xf32> -> vector<16x3xf32>
    %c0_9 = arith.constant 0 : index
    %c0_10 = arith.constant 0 : index
    %19 = vector.load %arg5[%c0_9, %c0_10] : memref<1x3xf32, #tpu.memory_space<vmem>>, vector<1x3xf32>
    %20 = vector.broadcast %19 : vector<1x3xf32> to vector<16x3xf32>
    %21 = arith.addf %18, %20 : vector<16x3xf32>
    %c0_11 = arith.constant 0 : index
    %c0_12 = arith.constant 0 : index
    %22 = vector.load %arg6[%c0_11, %c0_12] : memref<16x3xf32, #tpu.memory_space<vmem>>, vector<16x3xf32>
    tpu.vector_store %arg6[%c0_11, %c0_12], %21 {strides = array<i32>} : memref<16x3xf32, #tpu.memory_space<vmem>>, vector<16x3xf32>,
    return
  }
  func.func @transform_0(%arg0: i32) -> (i32, i32) {
    %c0_i32 = arith.constant 0 : i32
    %c0_i32_0 = arith.constant 0 : i32
    return %arg0, %c0_i32 : i32, i32
  }
  func.func @transform_1(%arg0: i32) -> (i32, i32) {
    %c0_i32 = arith.constant 0 : i32
    %c0_i32_0 = arith.constant 0 : i32
    %c0_i32_1 = arith.constant 0 : i32
    return %c0_i32, %c0_i32_0 : i32, i32
  }
  func.func @transform_2(%arg0: i32) -> (i32, i32) {
    %c0_i32 = arith.constant 0 : i32
    %c0_i32_0 = arith.constant 0 : i32
    %c0_i32_1 = arith.constant 0 : i32
    return %c0_i32, %c0_i32_0 : i32, i32
  }
  func.func @transform_3(%arg0: i32) -> (i32, i32) {
    %c0_i32 = arith.constant 0 : i32
    %c0_i32_0 = arith.constant 0 : i32
    %c0_i32_1 = arith.constant 0 : i32
    return %c0_i32, %c0_i32_0 : i32, i32
  }
  func.func @transform_4(%arg0: i32) -> (i32, i32) {
    %c0_i32 = arith.constant 0 : i32
    %c0_i32_0 = arith.constant 0 : i32
    %c0_i32_1 = arith.constant 0 : i32
    return %c0_i32, %c0_i32_0 : i32, i32
  }
  func.func @transform_5(%arg0: i32) -> (i32, i32) {
    %c0_i32 = arith.constant 0 : i32
    %c0_i32_0 = arith.constant 0 : i32
    return %arg0, %c0_i32 : i32, i32
  }
}

</mosaic_0001>

<bundles_post_ra>
// kernel: tpu_custom_call.1
= control target key start
LH: loop header
LB: loop body
LE: loop exit
PB: predicated region body
PF: predicated region fallthrough
CT: control target
= control target key end

     0   :  { %v266_v0 = vmov 1   ;;  %v267_v1 = vmov 0   ;;  %vm165_vm0 = vcmask 23552   ;;  %s370_s0 = inlined_call_operand.vmem [shape: f32[16,2], index: 0, kind: input, shape index: {}]   ;;  %s371_s3 = inlined_call_operand.vmem [shape: f32[128,3], index: 3, kind: input, shape index: {}]   ;;  %s372_s1 = inlined_call_operand.vmem [shape: f32[2,128], index: 1, kind: input, shape index: {}]   ;;  %s373_s2 = inlined_call_operand.vmem [shape: f32[1,128], index: 2, kind: input, shape index: {}]   ;;  %s374_s4 = inlined_call_operand.vmem [shape: f32[1,3], index: 4, kind: input, shape index: {}]   ;;  %s375_s5 = inlined_call_operand.vmem [shape: f32[16,3], index: 5, kind: output, shape index: {}]  }
   0x1   :  { %264 = vset.pattern.permute.xlu1 %v266_v0  ;;  %263 = vset.pattern.permute.xlu0 %v267_v1  ;;  %v20_v2 = vld [vmem:[%s370_s0] sm:$0xff]  ;;  %v68_v4 = vld [vmem:[%s371_s3 + $0x8] sm:$0xff]  ;;  %v69_v5 = vld [vmem:[%s371_s3 + $0x10] sm:$0xff] }
   0x2   :  { %v67_v3 = vld [vmem:[%s371_s3] sm:$0xff]  ;;  %50 = vperm.xlu1 %264, %v20_v2   ;;  %26 = vperm.xlu0 %263, %v20_v2   ;;  %v70_v6 = vld [vmem:[%s371_s3 + $0x18] sm:$0xff]  ;;  %v21_v7 = vld [vmem:[%s370_s0 + $0x8] sm:$0xff] }
   0x3   :  { %v229_v8 = vpack.c.bf16 %v68_v4, %v67_v3  ;;  %v233_v9 = vpack.c.bf16 %v70_v6, %v69_v5  ;;  %v71_v10 = vld [vmem:[%s371_s3 + $0x20] sm:$0xff]  ;;  %v72_v11 = vld [vmem:[%s371_s3 + $0x28] sm:$0xff]  ;;  %v73_v13 = vld [vmem:[%s371_s3 + $0x30] sm:$0xff] }
   0x4   :  { %v237_v12 = vpack.c.bf16 %v72_v11, %v71_v10  ;;  %v74_v14 = vld [vmem:[%s371_s3 + $0x38] sm:$0xff]  ;;  %v75_v16 = vld [vmem:[%s371_s3 + $0x40] sm:$0xff]  ;;  %v76_v17 = vld [vmem:[%s371_s3 + $0x48] sm:$0xff] }
   0x5   :  { %230 = vmatprep.subr.bf16.mxu0 %v229_v8  ;;  %v241_v15 = vpack.c.bf16 %v74_v14, %v73_v13  ;;  %v245_v18 = vpack.c.bf16 %v76_v17, %v75_v16  ;;  %v77_v19 = vld [vmem:[%s371_s3 + $0x50] sm:$0xff]  ;;  %v78_v20 = vld [vmem:[%s371_s3 + $0x58] sm:$0xff]  ;;  %v79_v22 = vld [vmem:[%s371_s3 + $0x60] sm:$0xff] }
   0x6   :  { %54 = vperm.xlu1 %264, %v21_v7   ;;  %31 = vperm.xlu0 %263, %v21_v7   ;;  %v249_v21 = vpack.c.bf16 %v78_v20, %v77_v19  ;;  %v80_v23 = vld [vmem:[%s371_s3 + $0x68] sm:$0xff]  ;;  %v81_v25 = vld [vmem:[%s371_s3 + $0x70] sm:$0xff]  ;;  %v82_v26 = vld [vmem:[%s371_s3 + $0x78] sm:$0xff] }
   0x7   :  { %232 = vmatpush3.bf16.msra.mxu0 %v229_v8  ;;  %v253_v24 = vpack.c.bf16 %v80_v23, %v79_v22  ;;  %v257_v27 = vpack.c.bf16 %v82_v26, %v81_v25  ;;  %v174_v28 = vld [vmem:[%s372_s1 + $0x1] ss:$0 sm:$0xff]  ;;  %v172_v29 = vld [vmem:[%s372_s1] ss:$0 sm:$0xff] }
   0x8   :  { %234 = vmatprep.subr.bf16.mxu0 %v233_v9  ;;  %v173_v32 = vld [vmem:[%s373_s2] ss:$0 sm:$0xff] }
   0x9   :  { %v175_v45 = vld [vmem:[%s374_s4] ss:$0 sm:$0xff] }
   0xa   :  { %265 = vset.pattern.permute.xlu0 %v266_v0 }
   0xb   :  { %236 = vmatpush3.bf16.msra.mxu0 %v233_v9 }
   0xc   :  { %238 = vmatprep.subr.bf16.mxu0 %v237_v12 }
   0xf   :  { %240 = vmatpush3.bf16.msra.mxu0 %v237_v12 }
  0x10   :  { %242 = vmatprep.subr.bf16.mxu0 %v241_v15 }
  0x13   :  { %244 = vmatpush3.bf16.msra.mxu0 %v241_v15 }
  0x14   :  { %246 = vmatprep.subr.bf16.mxu0 %v245_v18 }
  0x17   :  { %248 = vmatpush3.bf16.msra.mxu0 %v245_v18 }
  0x18   :  { %250 = vmatprep.subr.bf16.mxu0 %v249_v21 }
  0x1b   :  { %252 = vmatpush3.bf16.msra.mxu0 %v249_v21 }
  0x1c   :  { %254 = vmatprep.subr.bf16.mxu0 %v253_v24 }
  0x1f   :  { %256 = vmatpush3.bf16.msra.mxu0 %v253_v24 }
  0x20   :  { %258 = vmatprep.subr.bf16.mxu0 %v257_v27 }
  0x23   :  { %260 = vmatpush3.bf16.msra.mxu0 %v257_v27 }
  0x81   :  { %v51_v30 = vpop.permute.xlu1 %50  ;;  %v27_v31 = vpop.permute.xlu0 %26 }
  0x82   :  { %v61_v33 = vmul.f32 %v174_v28, %v51_v30  ;;  %v38_v34 = vmul.f32 %v172_v29, %v27_v31 }
  0x84   :  { %v46_v35 = vadd.f32 %v173_v32, %v38_v34 }
  0x85   :  { %v55_v36 = vpop.permute.xlu1 %54  ;;  %v32_v37 = vpop.permute.xlu0 %31 }
  0x86   :  { %v39_v38 = vmul.f32 %v172_v29, %v32_v37  ;;  %v63_v39 = vadd.f32 %v61_v33, %v46_v35  ;;  %v62_v40 = vmul.f32 %v174_v28, %v55_v36 }
  0x88   :  { %v47_v41 = vadd.f32 %v173_v32, %v39_v38  ;;  %v65_v42 = vmax.f32 %v63_v39, 0.0 }
  0x8a   :  { %226 = vmatprep.mubr.f32.mxu0 %v65_v42  ;;  %v64_v43 = vadd.f32 %v62_v40, %v47_v41 }
  0x8c   :  { %v66_v44 = vmax.f32 %v64_v43, 0.0 }
  0x8e   :  { %227 = vmatmul.mubr.f32.vlgmr.msra.gmra.mrb[0].mxu0 %v66_v44 }
 0x161   :  { %v228_v46 = vpop.f32.mrb[0].mxu0 }
 0x162   :  { %v162_v47 = vadd.f32 %v228_v46, %v175_v45  ;;  %v156_v48 = vpop.f32.mrb[1].mxu0 }
 0x163   :  { %v157_v49 = vadd.f32 %v175_v45, %v156_v48 }
 0x164   :  { %167 = vst.msk [vmem:[%s375_s5 + $0x8] sm:$0xff] %vm165_vm0, %v162_v47 }
 0x165   :  { %166 = vst.msk [vmem:[%s375_s5] sm:$0xff] %vm165_vm0, %v157_v49 }

</bundles_post_ra>
